<compile_context>
chip_gen: v6e
topology: v6e:2x2x1
jax: 0.10.0
libtpu: 0.0.40
codegen_flags: <defaults>
</compile_context>

<pallas_src>
import jax
import jax.numpy as jnp
import numpy as np
from jax.experimental import pallas as pl
from jax.experimental.pallas import tpu as pltpu

NLAYERS = 4
LANE = 128
SUB = 16  # sublane alignment safe for both f32 (8) and bf16 (16) tiles


def _round_up(n, m):
    return (n + m - 1) // m * m


def _pad2d(a, rows, cols, dtype=None):
    a = jnp.pad(a, ((0, rows - a.shape[0]), (0, cols - a.shape[1])))
    return a.astype(dtype) if dtype is not None else a


def _pnn_kernel(x_ref, y_ref, w0in_ref, w0h_ref, b0_ref,
                w1in_ref, w1h_ref, u1_ref, b1_ref, out_ref):
    """Interleaved two-column PNN forward for one batch tile.

    x_ref   : (TB, PX)      f32   column-0 input
    y_ref   : (TB, PY)      f32   column-1 input
    w0in_ref: (PX, P)       bf16  column-0 layer-0 weight
    w0h_ref : (3, P, P)     bf16  column-0 layers 1..3 weights
    b0_ref  : (4, 1, P)     f32   column-0 biases
    w1in_ref: (PY, P)       bf16  column-1 layer-0 own weight
    w1h_ref : (3, P, P)     bf16  column-1 layers 1..3 own weights
    u1_ref  : (4, P, P)     bf16  column-1 lateral weights (K = col-0 pre-act dims)
    b1_ref  : (4, 1, P)     f32   column-1 fused biases (b1 + ub1)
    out_ref : (TB, PO1)     f32   tanh(last pre-activation) of column 1
    """
    bf16 = jnp.bfloat16
    f32 = jnp.float32
    h0 = x_ref[...]
    h1 = y_ref[...]
    for i in range(NLAYERS):
        w0_i = w0in_ref[...] if i == 0 else w0h_ref[i - 1]
        w1_i = w1in_ref[...] if i == 0 else w1h_ref[i - 1]
        # ---- column 0, layer i: pre-activation z0 feeds the col-0 chain AND the lateral
        z0 = jnp.dot(h0.astype(bf16), w0_i, preferred_element_type=f32) + b0_ref[i]
        # ---- column 1, layer i: own-path dot + lateral dot (two K=P dots, no concat)
        z1 = (jnp.dot(h1.astype(bf16), w1_i, preferred_element_type=f32)
              + jnp.dot(z0.astype(bf16), u1_ref[i], preferred_element_type=f32)
              + b1_ref[i])
        if i == NLAYERS - 1:
            # column-0's final tanh is dead code for PNN.forward -> skipped
            h1 = jnp.tanh(z1)
        else:
            h0 = jnp.maximum(z0, 0.0)
            h1 = jnp.maximum(z1, 0.0)
    out_ref[...] = h1[:, :out_ref.shape[1]]


def pnn_forward(x, y, col0_params, col1_params, *, block_batch=512):
    """Pallas-backed PNN.forward(X, Y).  Returns out of shape (batch, out1)."""
    w0, b0 = col0_params
    w1, b1, u1, ub1 = col1_params
    batch = x.shape[0]
    out1 = w1[-1].shape[1]

    # lateral input of column 1, layer i, is column 0's pre-activation at layer i
    for i in range(NLAYERS):
        assert u1[i].shape[0] == w0[i].shape[1], "lateral in-dim must match col-0 out-dim"

    # --- lane padding ---------------------------------------------------------
    # Raw input dims get their own pad; hidden/output/lateral dims share P so
    # layers 1..3 still stack into a handful of slabs (few, large DMAs).
    PX = _round_up(x.shape[1], LANE)
    PY = _round_up(y.shape[1], LANE)
    feat = [w.shape[1] for w in list(w0) + list(w1) + list(u1)]
    feat += [w.shape[0] for w in list(w0)[1:] + list(w1)[1:] + list(u1)]
    P = _round_up(max(feat), LANE)
    PO1 = _round_up(out1, LANE)          # output slab only as wide as needed

    # --- batch tiling: last tile mostly real rows, tb multiple of 16 ----------
    n_tiles = max(1, -(-batch // block_batch))
    tb = min(_round_up(-(-batch // n_tiles), SUB), _round_up(block_batch, SUB))
    pb = _round_up(batch, tb)

    xp = jnp.pad(x, ((0, pb - batch), (0, PX - x.shape[1])))
    yp = jnp.pad(y, ((0, pb - batch), (0, PY - y.shape[1])))

    bf16 = jnp.bfloat16
    # column-0 slabs (weights pre-cast to bf16: half the pinned DMA / VMEM)
    w0_in = _pad2d(w0[0], PX, P, bf16)                                            # (PX, P)
    w0_h = jnp.stack([_pad2d(w0[i], P, P, bf16) for i in range(1, NLAYERS)])      # (3, P, P)
    b0_s = jnp.stack([_pad2d(b0[i].reshape(1, -1), 1, P) for i in range(NLAYERS)])  # (4,1,P) f32
    # column-1 slabs: own and lateral weights kept separate (two K=P dots per
    # layer instead of a lane-axis concat); biases fused (b1 + ub1)
    w1_in = _pad2d(w1[0], PY, P, bf16)                                            # (PY, P)
    w1_h = jnp.stack([_pad2d(w1[i], P, P, bf16) for i in range(1, NLAYERS)])      # (3, P, P)
    u1_s = jnp.stack([_pad2d(u1[i], P, P, bf16) for i in range(NLAYERS)])         # (4, P, P)
    b1_s = jnp.stack([_pad2d((b1[i] + ub1[i]).reshape(1, -1), 1, P)
                      for i in range(NLAYERS)])                                   # (4,1,P) f32

    pinned2 = lambda i: (0, 0)
    pinned3 = lambda i: (0, 0, 0)
    grid = (pb // tb,)

    out = pl.pallas_call(
        _pnn_kernel,
        out_shape=jax.ShapeDtypeStruct((pb, PO1), jnp.float32),
        grid_spec=pltpu.PrefetchScalarGridSpec(
            num_scalar_prefetch=0,
            grid=grid,
            in_specs=[
                pl.BlockSpec((tb, PX), lambda i: (i, 0)),                # x tile
                pl.BlockSpec((tb, PY), lambda i: (i, 0)),                # y tile
                pl.BlockSpec((PX, P), pinned2),                          # col-0 layer-0 W
                pl.BlockSpec((NLAYERS - 1, P, P), pinned3),              # col-0 layers 1..3 W
                pl.BlockSpec((NLAYERS, 1, P), pinned3),                  # col-0 biases
                pl.BlockSpec((PY, P), pinned2),                          # col-1 layer-0 W
                pl.BlockSpec((NLAYERS - 1, P, P), pinned3),              # col-1 layers 1..3 W
                pl.BlockSpec((NLAYERS, P, P), pinned3),                  # col-1 lateral W
                pl.BlockSpec((NLAYERS, 1, P), pinned3),                  # col-1 fused biases
            ],
            out_specs=pl.BlockSpec((tb, PO1), lambda i: (i, 0)),
        ),
        compiler_params=pltpu.CompilerParams(
            dimension_semantics=("parallel",),
        ),
    )(xp, yp, w0_in, w0_h, b0_s, w1_in, w1_h, u1_s, b1_s)

    return out[:batch, :out1]


# ------------------------------- references ----------------------------------
def pnn_reference_f32(x, y, w0, b0, w1, b1, u1, ub1):
    """Pure-JAX f32 reference of the PyTorch PNN.forward (two columns)."""
    h = x
    next0 = []
    for i in range(NLAYERS):
        z = h @ w0[i] + b0[i]
        next0.append(z)
        h = jnp.tanh(z) if i == NLAYERS - 1 else jnp.maximum(z, 0.0)
    h = y
    for i in range(NLAYERS):
        z = h @ w1[i] + b1[i] + next0[i] @ u1[i] + ub1[i]
        h = jnp.tanh(z) if i == NLAYERS - 1 else jnp.maximum(z, 0.0)
    return h


def pnn_reference_bf16(x, y, w0, b0, w1, b1, u1, ub1):
    """Reference emulating the kernel's bf16-operand / f32-accumulate dots."""
    bf = jnp.bfloat16
    f32 = jnp.float32
    h0, h1 = x, y
    for i in range(NLAYERS):
        z0 = jnp.dot(h0.astype(bf), w0[i].astype(bf), preferred_element_type=f32) + b0[i]
        z1 = (jnp.dot(h1.astype(bf), w1[i].astype(bf), preferred_element_type=f32)
              + jnp.dot(z0.astype(bf), u1[i].astype(bf), preferred_element_type=f32)
              + (b1[i] + ub1[i]))
        if i == NLAYERS - 1:
            h1 = jnp.tanh(z1)
        else:
            h0 = jnp.maximum(z0, 0.0)
            h1 = jnp.maximum(z1, 0.0)
    return h1


if __name__ == "__main__":
    # Small deterministic config: two columns, sizes = [[32, 32, 16], [24, 48, 16]].
    batch = 8
    in0, h0, o0 = 32, 32, 16
    in1, h1, o1 = 24, 48, 16
    prev = [h0, h0, h0, o0]                 # previous_size for column 1 (as in PNN.__init__)

    lin0, lout0 = [in0, h0, h0, h0], [h0, h0, h0, o0]
    lin1, lout1 = [in1, h1, h1, h1], [h1, h1, h1, o1]

    key = jax.random.PRNGKey(0)
    keys = iter(jax.random.split(key, 64))

    # Synthetic (non-zero) parameters so the forward pass is non-trivial.
    w0 = [0.1 * jax.random.normal(next(keys), (lin0[i], lout0[i]), jnp.float32) for i in range(NLAYERS)]
    b0 = [0.05 * jax.random.normal(next(keys), (lout0[i],), jnp.float32) for i in range(NLAYERS)]
    w1 = [0.1 * jax.random.normal(next(keys), (lin1[i], lout1[i]), jnp.float32) for i in range(NLAYERS)]
    b1 = [0.05 * jax.random.normal(next(keys), (lout1[i],), jnp.float32) for i in range(NLAYERS)]
    u1 = [0.1 * jax.random.normal(next(keys), (prev[i], lout1[i]), jnp.float32) for i in range(NLAYERS)]
    ub1 = [0.05 * jax.random.normal(next(keys), (lout1[i],), jnp.float32) for i in range(NLAYERS)]

    x = jax.random.normal(next(keys), (batch, in0), jnp.float32)   # PNN's X (column 0)
    y = jax.random.normal(next(keys), (batch, in1), jnp.float32)   # PNN's Y (column 1)

    out = pnn_forward(x, y, (w0, b0), (w1, b1, u1, ub1))
    out = jax.block_until_ready(out)

    # (1) tight check against a bf16-dot-emulating reference (same rounding regime)
    ref_bf16 = pnn_reference_bf16(x, y, w0, b0, w1, b1, u1, ub1)
    np.testing.assert_allclose(np.asarray(out), np.asarray(ref_bf16), rtol=2e-3, atol=2e-3)

    # (2) loose check against the exact f32 PyTorch-equivalent reference
    ref_f32 = pnn_reference_f32(x, y, w0, b0, w1, b1, u1, ub1)
    np.testing.assert_allclose(np.asarray(out), np.asarray(ref_f32), rtol=3e-2, atol=3e-2)

    print("KERNEL_OK")
</pallas_src>

<mosaic_0001>
module attributes {stable_mosaic.version = 11 : i64} {
  func.func @_pnn_kernel(%arg0: i32, %arg1: memref<16x128xf32, #tpu.memory_space<vmem>>, %arg2: memref<16x128xf32, #tpu.memory_space<vmem>>, %arg3: memref<128x128xbf16, #tpu.memory_space<vmem>>, %arg4: memref<3x128x128xbf16, #tpu.memory_space<vmem>>, %arg5: memref<4x1x128xf32, #tpu.memory_space<vmem>>, %arg6: memref<128x128xbf16, #tpu.memory_space<vmem>>, %arg7: memref<3x128x128xbf16, #tpu.memory_space<vmem>>, %arg8: memref<4x128x128xbf16, #tpu.memory_space<vmem>>, %arg9: memref<4x1x128xf32, #tpu.memory_space<vmem>>, %arg10: memref<16x128xf32, #tpu.memory_space<vmem>>) attributes {dimension_semantics = [#tpu.dimension_semantics<parallel>], iteration_bounds = array<i64: 1>, scalar_prefetch = 0 : i64, scratch_operands = 0 : i64, tpu.core_type = #tpu.core_type<tc>, window_params = [{transform_indices = @transform_0, window_bounds = array<i64: 16, 128>}, {transform_indices = @transform_1, window_bounds = array<i64: 16, 128>}, {pipeline_mode = #tpu.pipeline_mode<synchronous>, transform_indices = @transform_2, window_bounds = array<i64: 128, 128>}, {pipeline_mode = #tpu.pipeline_mode<synchronous>, transform_indices = @transform_3, window_bounds = array<i64: 3, 128, 128>}, {pipeline_mode = #tpu.pipeline_mode<synchronous>, transform_indices = @transform_4, window_bounds = array<i64: 4, 1, 128>}, {pipeline_mode = #tpu.pipeline_mode<synchronous>, transform_indices = @transform_5, window_bounds = array<i64: 128, 128>}, {pipeline_mode = #tpu.pipeline_mode<synchronous>, transform_indices = @transform_6, window_bounds = array<i64: 3, 128, 128>}, {pipeline_mode = #tpu.pipeline_mode<synchronous>, transform_indices = @transform_7, window_bounds = array<i64: 4, 128, 128>}, {pipeline_mode = #tpu.pipeline_mode<synchronous>, transform_indices = @transform_8, window_bounds = array<i64: 4, 1, 128>}, {transform_indices = @transform_9, window_bounds = array<i64: 16, 128>}]} {
    %c0 = arith.constant 0 : index
    %c0_0 = arith.constant 0 : index
    %0 = vector.load %arg1[%c0, %c0_0] : memref<16x128xf32, #tpu.memory_space<vmem>>, vector<16x128xf32>
    %c0_1 = arith.constant 0 : index
    %c0_2 = arith.constant 0 : index
    %1 = vector.load %arg2[%c0_1, %c0_2] : memref<16x128xf32, #tpu.memory_space<vmem>>, vector<16x128xf32>
    %c0_3 = arith.constant 0 : index
    %c0_4 = arith.constant 0 : index
    %2 = vector.load %arg3[%c0_3, %c0_4] : memref<128x128xbf16, #tpu.memory_space<vmem>>, vector<128x128xbf16>
    %c0_5 = arith.constant 0 : index
    %c0_6 = arith.constant 0 : index
    %3 = vector.load %arg6[%c0_5, %c0_6] : memref<128x128xbf16, #tpu.memory_space<vmem>>, vector<128x128xbf16>
    %4 = arith.truncf %0 : vector<16x128xf32> to vector<16x128xbf16>
    %cst = arith.constant dense<0.000000e+00> : vector<16x128xf32>
    %5 = tpu.matmul %4, %2, %cst {dimension_numbers = #tpu.dot_dimension_numbers<[1], [0], [0], [1], [0, 0, 1, 1], [], []>} : vector<16x128xbf16>, vector<128x128xbf16>, vector<16x128xf32> -> vector<16x128xf32>
    %c0_7 = arith.constant 0 : index
    %c0_8 = arith.constant 0 : index
    %c0_9 = arith.constant 0 : index
    %6 = vector.load %arg5[%c0_7, %c0_8, %c0_9] : memref<4x1x128xf32, #tpu.memory_space<vmem>>, vector<1x1x128xf32>
    %7 = vector.shape_cast %6 : vector<1x1x128xf32> to vector<1x128xf32>
    %8 = vector.broadcast %7 : vector<1x128xf32> to vector<16x128xf32>
    %9 = arith.addf %5, %8 : vector<16x128xf32>
    %10 = arith.truncf %1 : vector<16x128xf32> to vector<16x128xbf16>
    %cst_10 = arith.constant dense<0.000000e+00> : vector<16x128xf32>
    %11 = tpu.matmul %10, %3, %cst_10 {dimension_numbers = #tpu.dot_dimension_numbers<[1], [0], [0], [1], [0, 0, 1, 1], [], []>} : vector<16x128xbf16>, vector<128x128xbf16>, vector<16x128xf32> -> vector<16x128xf32>
    %12 = arith.truncf %9 : vector<16x128xf32> to vector<16x128xbf16>
    %c0_11 = arith.constant 0 : index
    %c0_12 = arith.constant 0 : index
    %c0_13 = arith.constant 0 : index
    %13 = vector.load %arg8[%c0_11, %c0_12, %c0_13] : memref<4x128x128xbf16, #tpu.memory_space<vmem>>, vector<1x128x128xbf16>
    %14 = vector.shape_cast %13 : vector<1x128x128xbf16> to vector<128x128xbf16>
    %cst_14 = arith.constant dense<0.000000e+00> : vector<16x128xf32>
    %15 = tpu.matmul %12, %14, %cst_14 {dimension_numbers = #tpu.dot_dimension_numbers<[1], [0], [0], [1], [0, 0, 1, 1], [], []>} : vector<16x128xbf16>, vector<128x128xbf16>, vector<16x128xf32> -> vector<16x128xf32>
    %16 = arith.addf %11, %15 : vector<16x128xf32>
    %c0_15 = arith.constant 0 : index
    %c0_16 = arith.constant 0 : index
    %c0_17 = arith.constant 0 : index
    %17 = vector.load %arg9[%c0_15, %c0_16, %c0_17] : memref<4x1x128xf32, #tpu.memory_space<vmem>>, vector<1x1x128xf32>
    %18 = vector.shape_cast %17 : vector<1x1x128xf32> to vector<1x128xf32>
    %19 = vector.broadcast %18 : vector<1x128xf32> to vector<16x128xf32>
    %20 = arith.addf %16, %19 : vector<16x128xf32>
    %cst_18 = arith.constant 0.000000e+00 : f32
    %21 = vector.broadcast %cst_18 : f32 to vector<16x128xf32>
    %22 = arith.maximumf %9, %21 : vector<16x128xf32>
    %cst_19 = arith.constant 0.000000e+00 : f32
    %23 = vector.broadcast %cst_19 : f32 to vector<16x128xf32>
    %24 = arith.maximumf %20, %23 : vector<16x128xf32>
    %c0_20 = arith.constant 0 : index
    %c0_21 = arith.constant 0 : index
    %c0_22 = arith.constant 0 : index
    %25 = vector.load %arg4[%c0_20, %c0_21, %c0_22] : memref<3x128x128xbf16, #tpu.memory_space<vmem>>, vector<1x128x128xbf16>
    %26 = vector.shape_cast %25 : vector<1x128x128xbf16> to vector<128x128xbf16>
    %c0_23 = arith.constant 0 : index
    %c0_24 = arith.constant 0 : index
    %c0_25 = arith.constant 0 : index
    %27 = vector.load %arg7[%c0_23, %c0_24, %c0_25] : memref<3x128x128xbf16, #tpu.memory_space<vmem>>, vector<1x128x128xbf16>
    %28 = vector.shape_cast %27 : vector<1x128x128xbf16> to vector<128x128xbf16>
    %29 = arith.truncf %22 : vector<16x128xf32> to vector<16x128xbf16>
    %cst_26 = arith.constant dense<0.000000e+00> : vector<16x128xf32>
    %30 = tpu.matmul %29, %26, %cst_26 {dimension_numbers = #tpu.dot_dimension_numbers<[1], [0], [0], [1], [0, 0, 1, 1], [], []>} : vector<16x128xbf16>, vector<128x128xbf16>, vector<16x128xf32> -> vector<16x128xf32>
    %c1 = arith.constant 1 : index
    %c0_27 = arith.constant 0 : index
    %c0_28 = arith.constant 0 : index
    %31 = vector.load %arg5[%c1, %c0_27, %c0_28] : memref<4x1x128xf32, #tpu.memory_space<vmem>>, vector<1x1x128xf32>
    %32 = vector.shape_cast %31 : vector<1x1x128xf32> to vector<1x128xf32>
    %33 = vector.broadcast %32 : vector<1x128xf32> to vector<16x128xf32>
    %34 = arith.addf %30, %33 : vector<16x128xf32>
    %35 = arith.truncf %24 : vector<16x128xf32> to vector<16x128xbf16>
    %cst_29 = arith.constant dense<0.000000e+00> : vector<16x128xf32>
    %36 = tpu.matmul %35, %28, %cst_29 {dimension_numbers = #tpu.dot_dimension_numbers<[1], [0], [0], [1], [0, 0, 1, 1], [], []>} : vector<16x128xbf16>, vector<128x128xbf16>, vector<16x128xf32> -> vector<16x128xf32>
    %37 = arith.truncf %34 : vector<16x128xf32> to vector<16x128xbf16>
    %c1_30 = arith.constant 1 : index
    %c0_31 = arith.constant 0 : index
    %c0_32 = arith.constant 0 : index
    %38 = vector.load %arg8[%c1_30, %c0_31, %c0_32] : memref<4x128x128xbf16, #tpu.memory_space<vmem>>, vector<1x128x128xbf16>
    %39 = vector.shape_cast %38 : vector<1x128x128xbf16> to vector<128x128xbf16>
    %cst_33 = arith.constant dense<0.000000e+00> : vector<16x128xf32>
    %40 = tpu.matmul %37, %39, %cst_33 {dimension_numbers = #tpu.dot_dimension_numbers<[1], [0], [0], [1], [0, 0, 1, 1], [], []>} : vector<16x128xbf16>, vector<128x128xbf16>, vector<16x128xf32> -> vector<16x128xf32>
    %41 = arith.addf %36, %40 : vector<16x128xf32>
    %c1_34 = arith.constant 1 : index
    %c0_35 = arith.constant 0 : index
    %c0_36 = arith.constant 0 : index
    %42 = vector.load %arg9[%c1_34, %c0_35, %c0_36] : memref<4x1x128xf32, #tpu.memory_space<vmem>>, vector<1x1x128xf32>
    %43 = vector.shape_cast %42 : vector<1x1x128xf32> to vector<1x128xf32>
    %44 = vector.broadcast %43 : vector<1x128xf32> to vector<16x128xf32>
    %45 = arith.addf %41, %44 : vector<16x128xf32>
    %cst_37 = arith.constant 0.000000e+00 : f32
    %46 = vector.broadcast %cst_37 : f32 to vector<16x128xf32>
    %47 = arith.maximumf %34, %46 : vector<16x128xf32>
    %cst_38 = arith.constant 0.000000e+00 : f32
    %48 = vector.broadcast %cst_38 : f32 to vector<16x128xf32>
    %49 = arith.maximumf %45, %48 : vector<16x128xf32>
    %c1_39 = arith.constant 1 : index
    %c0_40 = arith.constant 0 : index
    %c0_41 = arith.constant 0 : index
    %50 = vector.load %arg4[%c1_39, %c0_40, %c0_41] : memref<3x128x128xbf16, #tpu.memory_space<vmem>>, vector<1x128x128xbf16>
    %51 = vector.shape_cast %50 : vector<1x128x128xbf16> to vector<128x128xbf16>
    %c1_42 = arith.constant 1 : index
    %c0_43 = arith.constant 0 : index
    %c0_44 = arith.constant 0 : index
    %52 = vector.load %arg7[%c1_42, %c0_43, %c0_44] : memref<3x128x128xbf16, #tpu.memory_space<vmem>>, vector<1x128x128xbf16>
    %53 = vector.shape_cast %52 : vector<1x128x128xbf16> to vector<128x128xbf16>
    %54 = arith.truncf %47 : vector<16x128xf32> to vector<16x128xbf16>
    %cst_45 = arith.constant dense<0.000000e+00> : vector<16x128xf32>
    %55 = tpu.matmul %54, %51, %cst_45 {dimension_numbers = #tpu.dot_dimension_numbers<[1], [0], [0], [1], [0, 0, 1, 1], [], []>} : vector<16x128xbf16>, vector<128x128xbf16>, vector<16x128xf32> -> vector<16x128xf32>
    %c2 = arith.constant 2 : index
    %c0_46 = arith.constant 0 : index
    %c0_47 = arith.constant 0 : index
    %56 = vector.load %arg5[%c2, %c0_46, %c0_47] : memref<4x1x128xf32, #tpu.memory_space<vmem>>, vector<1x1x128xf32>
    %57 = vector.shape_cast %56 : vector<1x1x128xf32> to vector<1x128xf32>
    %58 = vector.broadcast %57 : vector<1x128xf32> to vector<16x128xf32>
    %59 = arith.addf %55, %58 : vector<16x128xf32>
    %60 = arith.truncf %49 : vector<16x128xf32> to vector<16x128xbf16>
    %cst_48 = arith.constant dense<0.000000e+00> : vector<16x128xf32>
    %61 = tpu.matmul %60, %53, %cst_48 {dimension_numbers = #tpu.dot_dimension_numbers<[1], [0], [0], [1], [0, 0, 1, 1], [], []>} : vector<16x128xbf16>, vector<128x128xbf16>, vector<16x128xf32> -> vector<16x128xf32>
    %62 = arith.truncf %59 : vector<16x128xf32> to vector<16x128xbf16>
    %c2_49 = arith.constant 2 : index
    %c0_50 = arith.constant 0 : index
    %c0_51 = arith.constant 0 : index
    %63 = vector.load %arg8[%c2_49, %c0_50, %c0_51] : memref<4x128x128xbf16, #tpu.memory_space<vmem>>, vector<1x128x128xbf16>
    %64 = vector.shape_cast %63 : vector<1x128x128xbf16> to vector<128x128xbf16>
    %cst_52 = arith.constant dense<0.000000e+00> : vector<16x128xf32>
    %65 = tpu.matmul %62, %64, %cst_52 {dimension_numbers = #tpu.dot_dimension_numbers<[1], [0], [0], [1], [0, 0, 1, 1], [], []>} : vector<16x128xbf16>, vector<128x128xbf16>, vector<16x128xf32> -> vector<16x128xf32>
    %66 = arith.addf %61, %65 : vector<16x128xf32>
    %c2_53 = arith.constant 2 : index
    %c0_54 = arith.constant 0 : index
    %c0_55 = arith.constant 0 : index
    %67 = vector.load %arg9[%c2_53, %c0_54, %c0_55] : memref<4x1x128xf32, #tpu.memory_space<vmem>>, vector<1x1x128xf32>
    %68 = vector.shape_cast %67 : vector<1x1x128xf32> to vector<1x128xf32>
    %69 = vector.broadcast %68 : vector<1x128xf32> to vector<16x128xf32>
    %70 = arith.addf %66, %69 : vector<16x128xf32>
    %cst_56 = arith.constant 0.000000e+00 : f32
    %71 = vector.broadcast %cst_56 : f32 to vector<16x128xf32>
    %72 = arith.maximumf %59, %71 : vector<16x128xf32>
    %cst_57 = arith.constant 0.000000e+00 : f32
    %73 = vector.broadcast %cst_57 : f32 to vector<16x128xf32>
    %74 = arith.maximumf %70, %73 : vector<16x128xf32>
    %c2_58 = arith.constant 2 : index
    %c0_59 = arith.constant 0 : index
    %c0_60 = arith.constant 0 : index
    %75 = vector.load %arg4[%c2_58, %c0_59, %c0_60] : memref<3x128x128xbf16, #tpu.memory_space<vmem>>, vector<1x128x128xbf16>
    %76 = vector.shape_cast %75 : vector<1x128x128xbf16> to vector<128x128xbf16>
    %c2_61 = arith.constant 2 : index
    %c0_62 = arith.constant 0 : index
    %c0_63 = arith.constant 0 : index
    %77 = vector.load %arg7[%c2_61, %c0_62, %c0_63] : memref<3x128x128xbf16, #tpu.memory_space<vmem>>, vector<1x128x128xbf16>
    %78 = vector.shape_cast %77 : vector<1x128x128xbf16> to vector<128x128xbf16>
    %79 = arith.truncf %72 : vector<16x128xf32> to vector<16x128xbf16>
    %cst_64 = arith.constant dense<0.000000e+00> : vector<16x128xf32>
    %80 = tpu.matmul %79, %76, %cst_64 {dimension_numbers = #tpu.dot_dimension_numbers<[1], [0], [0], [1], [0, 0, 1, 1], [], []>} : vector<16x128xbf16>, vector<128x128xbf16>, vector<16x128xf32> -> vector<16x128xf32>
    %c3 = arith.constant 3 : index
    %c0_65 = arith.constant 0 : index
    %c0_66 = arith.constant 0 : index
    %81 = vector.load %arg5[%c3, %c0_65, %c0_66] : memref<4x1x128xf32, #tpu.memory_space<vmem>>, vector<1x1x128xf32>
    %82 = vector.shape_cast %81 : vector<1x1x128xf32> to vector<1x128xf32>
    %83 = vector.broadcast %82 : vector<1x128xf32> to vector<16x128xf32>
    %84 = arith.addf %80, %83 : vector<16x128xf32>
    %85 = arith.truncf %74 : vector<16x128xf32> to vector<16x128xbf16>
    %cst_67 = arith.constant dense<0.000000e+00> : vector<16x128xf32>
    %86 = tpu.matmul %85, %78, %cst_67 {dimension_numbers = #tpu.dot_dimension_numbers<[1], [0], [0], [1], [0, 0, 1, 1], [], []>} : vector<16x128xbf16>, vector<128x128xbf16>, vector<16x128xf32> -> vector<16x128xf32>
    %87 = arith.truncf %84 : vector<16x128xf32> to vector<16x128xbf16>
    %c3_68 = arith.constant 3 : index
    %c0_69 = arith.constant 0 : index
    %c0_70 = arith.constant 0 : index
    %88 = vector.load %arg8[%c3_68, %c0_69, %c0_70] : memref<4x128x128xbf16, #tpu.memory_space<vmem>>, vector<1x128x128xbf16>
    %89 = vector.shape_cast %88 : vector<1x128x128xbf16> to vector<128x128xbf16>
    %cst_71 = arith.constant dense<0.000000e+00> : vector<16x128xf32>
    %90 = tpu.matmul %87, %89, %cst_71 {dimension_numbers = #tpu.dot_dimension_numbers<[1], [0], [0], [1], [0, 0, 1, 1], [], []>} : vector<16x128xbf16>, vector<128x128xbf16>, vector<16x128xf32> -> vector<16x128xf32>
    %91 = arith.addf %86, %90 : vector<16x128xf32>
    %c3_72 = arith.constant 3 : index
    %c0_73 = arith.constant 0 : index
    %c0_74 = arith.constant 0 : index
    %92 = vector.load %arg9[%c3_72, %c0_73, %c0_74] : memref<4x1x128xf32, #tpu.memory_space<vmem>>, vector<1x1x128xf32>
    %93 = vector.shape_cast %92 : vector<1x1x128xf32> to vector<1x128xf32>
    %94 = vector.broadcast %93 : vector<1x128xf32> to vector<16x128xf32>
    %95 = arith.addf %91, %94 : vector<16x128xf32>
    %96 = math.tanh %95 : vector<16x128xf32>
    %c0_75 = arith.constant 0 : index
    %c0_76 = arith.constant 0 : index
    %97 = vector.load %arg10[%c0_75, %c0_76] : memref<16x128xf32, #tpu.memory_space<vmem>>, vector<16x128xf32>
    tpu.vector_store %arg10[%c0_75, %c0_76], %96 {strides = array<i32>} : memref<16x128xf32, #tpu.memory_space<vmem>>, vector<16x128xf32>,
    return
  }
  func.func @transform_0(%arg0: i32) -> (i32, i32) {
    %c0_i32 = arith.constant 0 : i32
    %c0_i32_0 = arith.constant 0 : i32
    return %arg0, %c0_i32 : i32, i32
  }
  func.func @transform_1(%arg0: i32) -> (i32, i32) {
    %c0_i32 = arith.constant 0 : i32
    %c0_i32_0 = arith.constant 0 : i32
    return %arg0, %c0_i32 : i32, i32
  }
  func.func @transform_2(%arg0: i32) -> (i32, i32) {
    %c0_i32 = arith.constant 0 : i32
    %c0_i32_0 = arith.constant 0 : i32
    %c0_i32_1 = arith.constant 0 : i32
    return %c0_i32, %c0_i32_0 : i32, i32
  }
  func.func @transform_3(%arg0: i32) -> (i32, i32, i32) {
    %c0_i32 = arith.constant 0 : i32
    %c0_i32_0 = arith.constant 0 : i32
    %c0_i32_1 = arith.constant 0 : i32
    %c0_i32_2 = arith.constant 0 : i32
    return %c0_i32, %c0_i32_0, %c0_i32_1 : i32, i32, i32
  }
  func.func @transform_4(%arg0: i32) -> (i32, i32, i32) {
    %c0_i32 = arith.constant 0 : i32
    %c0_i32_0 = arith.constant 0 : i32
    %c0_i32_1 = arith.constant 0 : i32
    %c0_i32_2 = arith.constant 0 : i32
    return %c0_i32, %c0_i32_0, %c0_i32_1 : i32, i32, i32
  }
  func.func @transform_5(%arg0: i32) -> (i32, i32) {
    %c0_i32 = arith.constant 0 : i32
    %c0_i32_0 = arith.constant 0 : i32
    %c0_i32_1 = arith.constant 0 : i32
    return %c0_i32, %c0_i32_0 : i32, i32
  }
  func.func @transform_6(%arg0: i32) -> (i32, i32, i32) {
    %c0_i32 = arith.constant 0 : i32
    %c0_i32_0 = arith.constant 0 : i32
    %c0_i32_1 = arith.constant 0 : i32
    %c0_i32_2 = arith.constant 0 : i32
    return %c0_i32, %c0_i32_0, %c0_i32_1 : i32, i32, i32
  }
  func.func @transform_7(%arg0: i32) -> (i32, i32, i32) {
    %c0_i32 = arith.constant 0 : i32
    %c0_i32_0 = arith.constant 0 : i32
    %c0_i32_1 = arith.constant 0 : i32
    %c0_i32_2 = arith.constant 0 : i32
    return %c0_i32, %c0_i32_0, %c0_i32_1 : i32, i32, i32
  }
  func.func @transform_8(%arg0: i32) -> (i32, i32, i32) {
    %c0_i32 = arith.constant 0 : i32
    %c0_i32_0 = arith.constant 0 : i32
    %c0_i32_1 = arith.constant 0 : i32
    %c0_i32_2 = arith.constant 0 : i32
    return %c0_i32, %c0_i32_0, %c0_i32_1 : i32, i32, i32
  }
  func.func @transform_9(%arg0: i32) -> (i32, i32) {
    %c0_i32 = arith.constant 0 : i32
    %c0_i32_0 = arith.constant 0 : i32
    return %arg0, %c0_i32 : i32, i32
  }
}

</mosaic_0001>

<bundles_post_ra>
// kernel: tpu_custom_call.1
= control target key start
LH: loop header
LB: loop body
LE: loop exit
PB: predicated region body
PF: predicated region fallthrough
CT: control target
= control target key end

     0   :  { %14 = vsyncpa [#allocation3], 0  ;;  %s2516_s0 = inlined_call_operand.hbm [shape: f32[16,128], index: 0, kind: input, shape index: {}]   ;;  %s2517_s1 = inlined_call_operand.hbm [shape: f32[16,128], index: 1, kind: input, shape index: {}]   ;;  %s2518_s2 = inlined_call_operand.hbm [shape: bf16[128,128], index: 2, kind: input, shape index: {}]   ;;  %s2519_s3 = inlined_call_operand.hbm [shape: bf16[3,128,128], index: 3, kind: input, shape index: {}]   ;;  %s2520_s4 = inlined_call_operand.vmem [shape: f32[4,1,128], index: 4, kind: input, shape index: {}]   ;;  %s2521_s5 = inlined_call_operand.hbm [shape: bf16[128,128], index: 5, kind: input, shape index: {}]   ;;  %s2522_s6 = inlined_call_operand.hbm [shape: bf16[3,128,128], index: 6, kind: input, shape index: {}]   ;;  %s2523_s7 = inlined_call_operand.hbm [shape: bf16[4,128,128], index: 7, kind: input, shape index: {}]   ;;  %s2524_s8 = inlined_call_operand.vmem [shape: f32[4,1,128], index: 8, kind: input, shape index: {}]   ;;  %s2525_s9 = inlined_call_operand.hbm [shape: f32[16,128], index: 9, kind: output, shape index: {}]  }
   0x1   :  { %15 = vsyncpa [#allocation6], 0 }
   0x2   :  { %16 = vsyncpa [#allocation9], 0 }
   0x3   :  { %17 = vsyncpa [#allocation12], 0 }
   0x4   :  { %18 = vsyncpa [#allocation4], 0  ;;  %s2260_s30 = smov [#allocation5]  }
   0x5   :  { %s36_s10 = sshll.u32 %s2260_s30, 4  ;;  %s37_s10 = int_to_ptr.vmem [resolvable:$true] %s36_s10 }
   0x6   :  { %s2098_s11 = scalar_lea.vmem %s37_s10, 256  ;;  %p2103_p1 = scmp.lt.s32.totalorder %s37_s10, %s37_s10 }
   0x7   :  { %p2099_p0 = scmp.ne.s32.totalorder %s37_s10, %s2098_s11  ;;  %p2104_p2 = scmp.lt.s32.totalorder %s2098_s11, %s2098_s11 }
   0x9   :  { %p2105_p3 = por %p2104_p2, %p2103_p1 }
   0xb   :  { %p2106_p4 = pnand %p2105_p3, %p2099_p0 }
   0xd   :  { %2109 = shalt.err (!%p2106_p4)
}
   0xe   :  { %s2261_s12 = smov 128   ;;  %s2262_s13 = smov 8  }
   0xf   :  { %42 = dma.hbm_to_vmem [thread:$0]  %s2517_s1, 256, %s37_s10, [#allocation6], %s2261_s12, %s2261_s12, %s2262_s13  }
  0x10   :  { %s2263_s16 = smov [#allocation8]   ;;  %s2264_s18 = smov [#allocation11]  }
  0x11   :  { %s60_s17 = sshll.u32 %s2263_s16, 4  ;;  %s86_s19 = sshll.u32 %s2264_s18, 4  ;;  %s61_s17 = int_to_ptr.vmem [resolvable:$true] %s60_s17  ;;  %s87_s19 = int_to_ptr.vmem [resolvable:$true] %s86_s19 }
  0x12   :  { %s2118_s20 = scalar_lea.vmem %s61_s17, 3072  ;;  %p2123_p6 = scmp.lt.s32.totalorder %s61_s17, %s61_s17 }
  0x13   :  { %p2119_p5 = scmp.ne.s32.totalorder %s61_s17, %s2118_s20  ;;  %p2124_p7 = scmp.lt.s32.totalorder %s2118_s20, %s2118_s20 }
  0x15   :  { %p2125_p8 = por %p2124_p7, %p2123_p6 }
  0x17   :  { %p2126_p9 = pnand %p2125_p8, %p2119_p5 }
  0x19   :  { %2129 = shalt.err (!%p2126_p9)
}
  0x1a   :  { %s2265_s21 = smov 64   ;;  %s2266_s22 = smov 4  }
  0x1b   :  { %66 = dma.hbm_to_vmem [thread:$0]  %s2519_s3, 3072, %s61_s17, [#allocation9], %s2265_s21, %s2265_s21, %s2266_s22  }
  0x1c   :  { %s2138_s1 = scalar_lea.vmem %s87_s19, 3072  ;;  %p2143_p11 = scmp.lt.s32.totalorder %s87_s19, %s87_s19 }
  0x1d   :  { %p2139_p10 = scmp.ne.s32.totalorder %s87_s19, %s2138_s1  ;;  %p2144_p12 = scmp.lt.s32.totalorder %s2138_s1, %s2138_s1 }
  0x1f   :  { %p2145_p13 = por %p2144_p12, %p2143_p11 }
  0x21   :  { %p2146_p0 = pnand %p2145_p13, %p2139_p10 }
  0x23   :  { %2149 = shalt.err (!%p2146_p0)
}
  0x24   :  { %92 = dma.hbm_to_vmem [thread:$0]  %s2522_s6, 3072, %s87_s19, [#allocation12], %s2265_s21, %s2265_s21, %s2266_s22  }
  0x25   :  { %s2267_s27 = smov [#allocation2]   ;;  %s2268_s29 = smov [#allocation7]  }
  0x26   :  { %s24_s28 = sshll.u32 %s2267_s27, 4  ;;  %s48_s3 = sshll.u32 %s2268_s29, 4  ;;  %s25_s28 = int_to_ptr.vmem [resolvable:$true] %s24_s28  ;;  %s49_s3 = int_to_ptr.vmem [resolvable:$true] %s48_s3 }
  0x27   :  { %s2158_s30 = scalar_lea.vmem %s25_s28, 256  ;;  %p2163_p2 = scmp.lt.s32.totalorder %s25_s28, %s25_s28 }
  0x28   :  { %p2159_p1 = scmp.ne.s32.totalorder %s25_s28, %s2158_s30  ;;  %p2164_p3 = scmp.lt.s32.totalorder %s2158_s30, %s2158_s30 }
  0x2a   :  { %p2165_p4 = por %p2164_p3, %p2163_p2 }
  0x2c   :  { %p2166_p5 = pnand %p2165_p4, %p2159_p1 }
  0x2e   :  { %2169 = shalt.err (!%p2166_p5)
}
  0x2f   :  { %30 = dma.hbm_to_vmem [thread:$0]  %s2516_s0, 256, %s25_s28, [#allocation3], %s2261_s12, %s2261_s12, %s2262_s13  }
  0x30   :  { %s2178_s6 = scalar_lea.vmem %s49_s3, 1024  ;;  %p2183_p7 = scmp.lt.s32.totalorder %s49_s3, %s49_s3 }
  0x31   :  { %p2179_p6 = scmp.ne.s32.totalorder %s49_s3, %s2178_s6  ;;  %p2184_p8 = scmp.lt.s32.totalorder %s2178_s6, %s2178_s6 }
  0x33   :  { %p2185_p9 = por %p2184_p8, %p2183_p7 }
  0x35   :  { %p2186_p10 = pnand %p2185_p9, %p2179_p6 }
  0x37   :  { %2189 = shalt.err (!%p2186_p10)
}
  0x38   :  { %54 = dma.hbm_to_vmem [thread:$0]  %s2518_s2, 1024, %s49_s3, [#allocation6], %s2265_s21, %s2265_s21, %s2266_s22  }
  0x39   :  { %s2269_s16 = smov [#allocation10]   ;;  %s2270_s18 = smov [#allocation13]  }
  0x3a   :  { %s74_s17 = sshll.u32 %s2269_s16, 4  ;;  %s98_s0 = sshll.u32 %s2270_s18, 4  ;;  %s75_s17 = int_to_ptr.vmem [resolvable:$true] %s74_s17  ;;  %s99_s0 = int_to_ptr.vmem [resolvable:$true] %s98_s0 }
  0x3b   :  { %s2198_s19 = scalar_lea.vmem %s75_s17, 1024  ;;  %p2203_p12 = scmp.lt.s32.totalorder %s75_s17, %s75_s17 }
  0x3c   :  { %p2199_p11 = scmp.ne.s32.totalorder %s75_s17, %s2198_s19  ;;  %p2204_p13 = scmp.lt.s32.totalorder %s2198_s19, %s2198_s19 }
  0x3e   :  { %p2205_p0 = por %p2204_p13, %p2203_p12 }
  0x40   :  { %p2206_p1 = pnand %p2205_p0, %p2199_p11 }
  0x42   :  { %2209 = shalt.err (!%p2206_p1)
}
  0x43   :  { %80 = dma.hbm_to_vmem [thread:$0]  %s2521_s5, 1024, %s75_s17, [#allocation9], %s2265_s21, %s2265_s21, %s2266_s22  }
  0x44   :  { %s2218_s2 = scalar_lea.vmem %s99_s0, 4096  ;;  %p2223_p3 = scmp.lt.s32.totalorder %s99_s0, %s99_s0 }
  0x45   :  { %p2219_p2 = scmp.ne.s32.totalorder %s99_s0, %s2218_s2  ;;  %p2224_p4 = scmp.lt.s32.totalorder %s2218_s2, %s2218_s2 }
  0x47   :  { %p2225_p5 = por %p2224_p4, %p2223_p3 }
  0x49   :  { %p2226_p6 = pnand %p2225_p5, %p2219_p2 }
  0x4b   :  { %2229 = shalt.err (!%p2226_p6)
}
  0x4c   :  { %104 = dma.hbm_to_vmem [thread:$0]  %s2523_s7, 4096, %s99_s0, [#allocation12], %s2265_s21, %s2265_s21, %s2266_s22  }
  0x4d   :  { %2250 = dma.done.wait [#allocation3], 256  }
  0x4e   :  { %2251 = vsyncadd [#allocation3], 4294967040 }
  0x4f   :  { %2252 = dma.done.wait [#allocation6], 1280  }
  0x50   :  { %2253 = vsyncadd [#allocation6], 4294966016 }
  0x51   :  { %2254 = dma.done.wait [#allocation9], 4096  }
  0x52   :  { %2255 = vsyncadd [#allocation9], 4294963200 }
  0x53   :  { %2256 = dma.done.wait [#allocation12], 7168  }
  0x54   :  { %2257 = vsyncadd [#allocation12], 4294960128  ;;  %v2271_v0 = vmov 0.0   ;;  %vm2272_vm0 = vmmov 0   ;;  %v1990_v1 = vld [vmem:[#allocation7 + $0x38] sm:$0xff]   ;;  %v1991_v2 = vld [vmem:[#allocation7 + $0x30] sm:$0xff]  }
  0x55   :  { %1736 = vmatprep.subr.bf16.mxu0 %v2271_v0  ;;  %1752 = vmatprep.mubr.msk.bf16.mxu0 %vm2272_vm0, %v2271_v0  ;;  %v1992_v3 = vld [vmem:[#allocation7 + $0x28] sm:$0xff]   ;;  %v1998_v4 = vld [vmem:[#allocation13 + $0x38] sm:$0xff]   ;;  %v1993_v5 = vld [vmem:[#allocation7 + $0x20] sm:$0xff]  }
  0x56   :  { %1756 = vmatprep.subr.bf16.mxu1 %v2271_v0  ;;  %1772 = vmatprep.mubr.msk.bf16.mxu1 %vm2272_vm0, %v2271_v0  ;;  %v2000_v6 = vld [vmem:[#allocation13 + $0x30] sm:$0xff]   ;;  %v1994_v7 = vld [vmem:[#allocation7 + $0x18] sm:$0xff]   ;;  %v2002_v8 = vld [vmem:[#allocation13 + $0x28] sm:$0xff]  }
  0x57   :  { %1737 = vmatpush3.bf16.msra.mxu0 %v1990_v1  ;;  %1757 = vmatpush3.bf16.msra.mxu1 %v1998_v4  ;;  %v1995_v9 = vld [vmem:[#allocation7 + $0x10] sm:$0xff]   ;;  %v2004_v10 = vld [vmem:[#allocation13 + $0x20] sm:$0xff]   ;;  %v1996_v11 = vld [vmem:[#allocation7 + $0x8] sm:$0xff]  }
  0x58   :  { %1738 = vmatprep.subr.bf16.mxu0 %v2271_v0  ;;  %1758 = vmatprep.subr.bf16.mxu1 %v2271_v0  ;;  %v2006_v12 = vld [vmem:[#allocation13 + $0x18] sm:$0xff]   ;;  %v1997_v13 = vld [vmem:[#allocation7] sm:$0xff]   ;;  %v130_v15 = vld [vmem:[#allocation2 + $0x8] sm:$0xff] }
  0x59   :  { %v129_v14 = vld [vmem:[#allocation2] sm:$0xff]  ;;  %v2008_v16 = vld [vmem:[#allocation13 + $0x10] sm:$0xff]   ;;  %v1999_v17 = vld [vmem:[#allocation10 + $0x38] sm:$0xff]  }
  0x5a   :  { %v165_v18 = vpack.c.bf16 %v130_v15, %v129_v14  ;;  %v2001_v19 = vld [vmem:[#allocation10 + $0x30] sm:$0xff]   ;;  %v2003_v20 = vld [vmem:[#allocation10 + $0x28] sm:$0xff]   ;;  %v2005_v21 = vld [vmem:[#allocation10 + $0x20] sm:$0xff]  }
  0x5b   :  { %1739 = vmatpush3.bf16.msra.mxu0 %v1991_v2  ;;  %1759 = vmatpush3.bf16.msra.mxu1 %v2000_v6  ;;  %v2007_v22 = vld [vmem:[#allocation10 + $0x18] sm:$0xff]   ;;  %v2009_v23 = vld [vmem:[#allocation10 + $0x10] sm:$0xff]   ;;  %v2010_v24 = vld [vmem:[#allocation13 + $0x8] sm:$0xff]  }
  0x5c   :  { %1740 = vmatprep.subr.bf16.mxu0 %v2271_v0  ;;  %1760 = vmatprep.subr.bf16.mxu1 %v2271_v0  ;;  %v2011_v25 = vld [vmem:[#allocation10 + $0x8] sm:$0xff]   ;;  %v2012_v26 = vld [vmem:[#allocation13] sm:$0xff]   ;;  %v131_v28 = vld [vmem:[#allocation5] sm:$0xff] }
  0x5d   :  { %v2013_v27 = vld [vmem:[#allocation10] sm:$0xff]   ;;  %v132_v29 = vld [vmem:[#allocation5 + $0x8] sm:$0xff]  ;;  %v2015_v40 = vld [vmem:[#allocation8 + $0x30] sm:$0xff]  }
  0x5e   :  { %v262_v30 = vpack.c.bf16 %v132_v29, %v131_v28  ;;  %v1518_v32 = vld [vmem:[%s2520_s4] ss:$0 sm:$0xff]  ;;  %v2014_v38 = vld [vmem:[#allocation8 + $0x38] sm:$0xff]   ;;  %v2016_v41 = vld [vmem:[#allocation8 + $0x28] sm:$0xff]  }
  0x5f   :  { %1741 = vmatpush3.bf16.msra.mxu0 %v1992_v3  ;;  %1761 = vmatpush3.bf16.msra.mxu1 %v2002_v8  ;;  %v2017_v42 = vld [vmem:[#allocation8 + $0x20] sm:$0xff]   ;;  %v2018_v43 = vld [vmem:[#allocation8 + $0x18] sm:$0xff]   ;;  %v2019_v44 = vld [vmem:[#allocation8 + $0x10] sm:$0xff]  }
  0x60   :  { %1742 = vmatprep.subr.bf16.mxu0 %v2271_v0  ;;  %1762 = vmatprep.subr.bf16.mxu1 %v2271_v0  ;;  %v2020_v45 = vld [vmem:[#allocation8 + $0x8] sm:$0xff]   ;;  %v2021_v46 = vld [vmem:[#allocation8] sm:$0xff]   ;;  %v2022_v49 = vld [vmem:[#allocation11 + $0x38] sm:$0xff]  }
  0x61   :  { %v2023_v51 = vld [vmem:[#allocation11 + $0x30] sm:$0xff]   ;;  %v2024_v52 = vld [vmem:[#allocation11 + $0x28] sm:$0xff]   ;;  %v2025_v53 = vld [vmem:[#allocation11 + $0x20] sm:$0xff]  }
  0x62   :  { %v2026_v54 = vld [vmem:[#allocation11 + $0x18] sm:$0xff]   ;;  %v2027_v56 = vld [vmem:[#allocation11 + $0x10] sm:$0xff]   ;;  %v2028_v59 = vld [vmem:[#allocation11 + $0x8] sm:$0xff]  }
  0x63   :  { %1743 = vmatpush3.bf16.msra.mxu0 %v1993_v5  ;;  %1763 = vmatpush3.bf16.msra.mxu1 %v2004_v10  ;;  %v2029_v60 = vld [vmem:[#allocation13 + $0x78] sm:$0xff]   ;;  %v2030_v62 = vld [vmem:[#allocation11] sm:$0xff]   ;;  %v2031_v63 = vld [vmem:[#allocation13 + $0x70] sm:$0xff]  }
  0x64   :  { %1744 = vmatprep.subr.bf16.mxu0 %v2271_v0  ;;  %1764 = vmatprep.subr.bf16.mxu1 %v2271_v0  ;;  %v2032_v1 = vld [vmem:[#allocation13 + $0x68] sm:$0xff]   ;;  %v2033_v2 = vld [vmem:[#allocation13 + $0x60] sm:$0xff]   ;;  %v2034_v3 = vld [vmem:[#allocation13 + $0x58] sm:$0xff]  }
  0x65   :  { %v2035_v4 = vld [vmem:[#allocation13 + $0x50] sm:$0xff]   ;;  %v2036_v5 = vld [vmem:[#allocation13 + $0x48] sm:$0xff]   ;;  %v2037_v6 = vld [vmem:[#allocation13 + $0x40] sm:$0xff]  }
  0x66   :  { %v2039_v28 = vld [vmem:[#allocation8 + $0x70] sm:$0xff]   ;;  %v2040_v29 = vld [vmem:[#allocation8 + $0x68] sm:$0xff]  }
  0x67   :  { %1745 = vmatpush3.bf16.msra.mxu0 %v1994_v7  ;;  %1765 = vmatpush3.bf16.msra.mxu1 %v2006_v12 }
  0x68   :  { %1746 = vmatprep.subr.bf16.mxu0 %v2271_v0  ;;  %1766 = vmatprep.subr.bf16.mxu1 %v2271_v0 }
  0x6b   :  { %1747 = vmatpush3.bf16.msra.mxu0 %v1995_v9  ;;  %1767 = vmatpush3.bf16.msra.mxu1 %v2008_v16  ;;  %v1543_v9 = vld [vmem:[%s2524_s8] ss:$0 sm:$0xff] }
  0x6c   :  { %1748 = vmatprep.subr.bf16.mxu0 %v2271_v0  ;;  %1768 = vmatprep.subr.bf16.mxu1 %v2271_v0 }
  0x6f   :  { %1749 = vmatpush3.bf16.msra.mxu0 %v1996_v11  ;;  %1769 = vmatpush3.bf16.msra.mxu1 %v2010_v24 }
  0x70   :  { %1750 = vmatprep.subr.bf16.mxu0 %v2271_v0  ;;  %1770 = vmatprep.subr.bf16.mxu1 %v2271_v0 }
  0x73   :  { %1751 = vmatpush3.bf16.msra.mxu0 %v1997_v13  ;;  %1771 = vmatpush3.bf16.msra.mxu1 %v2012_v26  ;;  %v2038_v26 = vld [vmem:[#allocation8 + $0x78] sm:$0xff]  }
  0x74   :  { %1776 = vmatprep.subr.bf16.mxu0 %v2271_v0  ;;  %1796 = vmatprep.subr.bf16.mxu1 %v2271_v0 }
  0x76   :  { %1753 = vmatmul.mubr.bf16.vlgmr.msra.gmra.mxu0 %v165_v18 }
  0x77   :  { %1777 = vmatpush3.bf16.msra.mxu0 %v1999_v17  ;;  %1792 = vmatprep.mubr.msk.bf16.mxu0 %vm2272_vm0, %v2271_v0 }
  0x78   :  { %1778 = vmatprep.subr.bf16.mxu0 %v2271_v0 }
  0x7b   :  { %1779 = vmatpush3.bf16.msra.mxu0 %v2001_v19 }
  0x7c   :  { %1780 = vmatprep.subr.bf16.mxu0 %v2271_v0 }
  0x7f   :  { %1781 = vmatpush3.bf16.msra.mxu0 %v2003_v20  ;;  %v1545_v20 = vld [vmem:[%s2520_s4 + $0x1] ss:$0 sm:$0xff] }
  0x80   :  { %1782 = vmatprep.subr.bf16.mxu0 %v2271_v0 }
  0x83   :  { %1783 = vmatpush3.bf16.msra.mxu0 %v2005_v21 }
  0x84   :  { %1784 = vmatprep.subr.bf16.mxu0 %v2271_v0 }
  0x87   :  { %1785 = vmatpush3.bf16.msra.mxu0 %v2007_v22 }
  0x88   :  { %1786 = vmatprep.subr.bf16.mxu0 %v2271_v0 }
  0x8b   :  { %1787 = vmatpush3.bf16.msra.mxu0 %v2009_v23 }
  0x8c   :  { %1788 = vmatprep.subr.bf16.mxu0 %v2271_v0 }
  0x8f   :  { %1789 = vmatpush3.bf16.msra.mxu0 %v2011_v25 }
  0x90   :  { %1790 = vmatprep.subr.bf16.mxu0 %v2271_v0 }
  0x93   :  { %1791 = vmatpush3.bf16.msra.mxu0 %v2013_v27 }
  0x94   :  { %1816 = vmatprep.subr.bf16.mxu0 %v2271_v0 }
  0x96   :  { %1793 = vmatmul.mubr.bf16.vlgmr.msra.gmra.mxu0 %v262_v30  ;;  %v2041_v30 = vld [vmem:[#allocation8 + $0x60] sm:$0xff]  }
  0x97   :  { %1832 = vmatprep.mubr.msk.bf16.mxu0 %vm2272_vm0, %v2271_v0  ;;  %1817 = vmatpush3.bf16.msra.mxu0 %v2029_v60  ;;  %v1571_v60 = vld [vmem:[%s2524_s8 + $0x1] ss:$0 sm:$0xff] }
  0x98   :  { %1818 = vmatprep.subr.bf16.mxu0 %v2271_v0 }
  0x9b   :  { %1819 = vmatpush3.bf16.msra.mxu0 %v2031_v63 }
  0x9c   :  { %1820 = vmatprep.subr.bf16.mxu0 %v2271_v0 }
  0x9f   :  { %1821 = vmatpush3.bf16.msra.mxu0 %v2032_v1 }
  0xa0   :  { %1822 = vmatprep.subr.bf16.mxu0 %v2271_v0 }
  0xa3   :  { %1823 = vmatpush3.bf16.msra.mxu0 %v2033_v2 }
  0xa4   :  { %1824 = vmatprep.subr.bf16.mxu0 %v2271_v0 }
  0xa7   :  { %1825 = vmatpush3.bf16.msra.mxu0 %v2034_v3 }
  0xa8   :  { %1826 = vmatprep.subr.bf16.mxu0 %v2271_v0 }
  0xab   :  { %1827 = vmatpush3.bf16.msra.mxu0 %v2035_v4 }
  0xac   :  { %1828 = vmatprep.subr.bf16.mxu0 %v2271_v0 }
  0xaf   :  { %1829 = vmatpush3.bf16.msra.mxu0 %v2036_v5 }
  0xb0   :  { %1830 = vmatprep.subr.bf16.mxu0 %v2271_v0 }
  0xb3   :  { %1831 = vmatpush3.bf16.msra.mxu0 %v2037_v6 }
  0xb4   :  { %1856 = vmatprep.subr.bf16.mxu0 %v2271_v0 }
 0x136   :  { %v255_v31 = vpop.f32.mrf.mxu0 }
 0x137   :  { %v256_v35 = vadd.f32 %v1518_v32, %v255_v31  ;;  %v2042_v31 = vld [vmem:[#allocation8 + $0x58] sm:$0xff]  }
 0x138   :  { %v1754_v33 = vpop.f32.mrf.mxu0 }
 0x139   :  { %v467_v48 = vmax.f32 %v256_v35, 0.0  ;;  %v2044_v33 = vld [vmem:[#allocation8 + $0x48] sm:$0xff]  }
 0x13a   :  { %v258_v34 = vpop.f32.mrf.mxu0 }
 0x13b   :  { %v259_v36 = vadd.f32 %v1518_v32, %v258_v34  ;;  %v2043_v32 = vld [vmem:[#allocation8 + $0x50] sm:$0xff]   ;;  %v2045_v34 = vld [vmem:[#allocation8 + $0x40] sm:$0xff]  }
 0x13c   :  { %v1755_v37 = vpop.f32.mrf.mxu0 }
 0x13d   :  { %v263_v39 = vpack.c.bf16 %v259_v36, %v256_v35  ;;  %v468_v47 = vmax.f32 %v259_v36, 0.0 }
 0x13f   :  { %1773 = vmatmul.mubr.bf16.vlgmr.msra.gmra.mxu1 %v263_v39  ;;  %v503_v50 = vpack.c.bf16 %v468_v47, %v467_v48  ;;  %v2047_v39 = vld [vmem:[#allocation11 + $0x70] sm:$0xff]   ;;  %v2056_v48 = vld [vmem:[#allocation13 + $0xa8] sm:$0xff]  }
 0x140   :  { %1797 = vmatpush3.bf16.msra.mxu1 %v2014_v38  ;;  %1812 = vmatprep.mubr.msk.bf16.mxu1 %vm2272_vm0, %v2271_v0  ;;  %v2046_v38 = vld [vmem:[#allocation11 + $0x78] sm:$0xff]   ;;  %v2055_v47 = vld [vmem:[#allocation13 + $0xb0] sm:$0xff]  }
 0x141   :  { %1798 = vmatprep.subr.bf16.mxu1 %v2271_v0 }
 0x144   :  { %1799 = vmatpush3.bf16.msra.mxu1 %v2015_v40  ;;  %v2048_v40 = vld [vmem:[#allocation11 + $0x68] sm:$0xff]  }
 0x145   :  { %1800 = vmatprep.subr.bf16.mxu1 %v2271_v0 }
 0x148   :  { %1801 = vmatpush3.bf16.msra.mxu1 %v2016_v41  ;;  %v2049_v41 = vld [vmem:[#allocation11 + $0x60] sm:$0xff]  }
 0x149   :  { %1802 = vmatprep.subr.bf16.mxu1 %v2271_v0 }
 0x14c   :  { %1803 = vmatpush3.bf16.msra.mxu1 %v2017_v42  ;;  %v2050_v42 = vld [vmem:[#allocation11 + $0x58] sm:$0xff]  }
 0x14d   :  { %1804 = vmatprep.subr.bf16.mxu1 %v2271_v0 }
 0x150   :  { %1805 = vmatpush3.bf16.msra.mxu1 %v2018_v43  ;;  %v2051_v43 = vld [vmem:[#allocation11 + $0x50] sm:$0xff]  }
 0x151   :  { %1806 = vmatprep.subr.bf16.mxu1 %v2271_v0 }
 0x154   :  { %1807 = vmatpush3.bf16.msra.mxu1 %v2019_v44  ;;  %v2052_v44 = vld [vmem:[#allocation11 + $0x48] sm:$0xff]  }
 0x155   :  { %1808 = vmatprep.subr.bf16.mxu1 %v2271_v0 }
 0x156   :  { %v451_v55 = vpop.f32.mrf.mxu0 }
 0x158   :  { %1809 = vmatpush3.bf16.msra.mxu1 %v2020_v45  ;;  %v1794_v57 = vpop.f32.mrf.mxu0  ;;  %v2053_v45 = vld [vmem:[#allocation13 + $0xb8] sm:$0xff]  }
 0x159   :  { %1810 = vmatprep.subr.bf16.mxu1 %v2271_v0 }
 0x15a   :  { %v454_v58 = vpop.f32.mrf.mxu0 }
 0x15c   :  { %1811 = vmatpush3.bf16.msra.mxu1 %v2021_v46  ;;  %v1795_v61 = vpop.f32.mrf.mxu0  ;;  %v2054_v46 = vld [vmem:[#allocation11 + $0x40] sm:$0xff]  }
 0x15d   :  { %1836 = vmatprep.subr.bf16.mxu1 %v2271_v0 }
 0x15f   :  { %1813 = vmatmul.mubr.bf16.vlgmr.msra.gmra.mxu1 %v503_v50  ;;  %v2058_v50 = vld [vmem:[#allocation13 + $0x98] sm:$0xff]  }
 0x160   :  { %1837 = vmatpush3.bf16.msra.mxu1 %v2022_v49  ;;  %1852 = vmatprep.mubr.msk.bf16.mxu1 %vm2272_vm0, %v2271_v0  ;;  %v2057_v49 = vld [vmem:[#allocation13 + $0xa0] sm:$0xff]  }
 0x161   :  { %1838 = vmatprep.subr.bf16.mxu1 %v2271_v0 }
 0x164   :  { %1839 = vmatpush3.bf16.msra.mxu1 %v2023_v51  ;;  %v2059_v51 = vld [vmem:[#allocation13 + $0x90] sm:$0xff]  }
 0x165   :  { %1840 = vmatprep.subr.bf16.mxu1 %v2271_v0 }
 0x168   :  { %1841 = vmatpush3.bf16.msra.mxu1 %v2024_v52  ;;  %v2060_v52 = vld [vmem:[#allocation13 + $0x88] sm:$0xff]  }
 0x169   :  { %1842 = vmatprep.subr.bf16.mxu1 %v2271_v0 }
 0x16c   :  { %1843 = vmatpush3.bf16.msra.mxu1 %v2025_v53  ;;  %v2061_v53 = vld [vmem:[#allocation13 + $0x80] sm:$0xff]  }
 0x16d   :  { %1844 = vmatprep.subr.bf16.mxu1 %v2271_v0 }
 0x170   :  { %1845 = vmatpush3.bf16.msra.mxu1 %v2026_v54 }
 0x171   :  { %1846 = vmatprep.subr.bf16.mxu1 %v2271_v0 }
 0x174   :  { %1847 = vmatpush3.bf16.msra.mxu1 %v2027_v56 }
 0x175   :  { %1848 = vmatprep.subr.bf16.mxu1 %v2271_v0 }
 0x178   :  { %1849 = vmatpush3.bf16.msra.mxu1 %v2028_v59 }
 0x179   :  { %1850 = vmatprep.subr.bf16.mxu1 %v2271_v0 }
 0x17c   :  { %1851 = vmatpush3.bf16.msra.mxu1 %v2030_v62 }
 0x17d   :  { %1876 = vmatprep.subr.bf16.mxu1 %v2271_v0 }
 0x1ff   :  { %v362_v7 = vpop.f32.mrf.mxu1 }
 0x200   :  { %v452_v8 = vadd.f32 %v451_v55, %v362_v7 }
 0x201   :  { %v1774_v10 = vpop.f32.mrf.mxu1 }
 0x202   :  { %v465_v12 = vadd.f32 %v1543_v9, %v452_v8  ;;  %v1573_v8 = vld [vmem:[%s2520_s4 + $0x2] ss:$0 sm:$0xff] }
 0x203   :  { %v365_v11 = vpop.f32.mrf.mxu1 }
 0x204   :  { %v455_v13 = vadd.f32 %v454_v58, %v365_v11  ;;  %v469_v16 = vmax.f32 %v465_v12, 0.0 }
 0x205   :  { %v1775_v14 = vpop.f32.mrf.mxu1 }
 0x206   :  { %v466_v15 = vadd.f32 %v1543_v9, %v455_v13  ;;  %v2062_v14 = vld [vmem:[#allocation8 + $0xb8] sm:$0xff]  }
 0x208   :  { %v470_v17 = vmax.f32 %v466_v15, 0.0 }
 0x20a   :  { %v601_v18 = vpack.c.bf16 %v470_v17, %v469_v16  ;;  %v2063_v16 = vld [vmem:[#allocation8 + $0xb0] sm:$0xff]   ;;  %v2064_v17 = vld [vmem:[#allocation8 + $0xa8] sm:$0xff]  }
 0x20c   :  { %1853 = vmatmul.mubr.bf16.vlgmr.msra.gmra.mxu1 %v601_v18  ;;  %v2065_v18 = vld [vmem:[#allocation8 + $0xa0] sm:$0xff]  }
 0x20d   :  { %1892 = vmatprep.mubr.msk.bf16.mxu1 %vm2272_vm0, %v2271_v0  ;;  %1877 = vmatpush3.bf16.msra.mxu1 %v2053_v45 }
 0x20e   :  { %1878 = vmatprep.subr.bf16.mxu1 %v2271_v0 }
 0x211   :  { %1879 = vmatpush3.bf16.msra.mxu1 %v2055_v47 }
 0x212   :  { %1880 = vmatprep.subr.bf16.mxu1 %v2271_v0 }
 0x215   :  { %1881 = vmatpush3.bf16.msra.mxu1 %v2056_v48  ;;  %v1599_v48 = vld [vmem:[%s2524_s8 + $0x2] ss:$0 sm:$0xff] }
 0x216   :  { %1882 = vmatprep.subr.bf16.mxu1 %v2271_v0 }
 0x219   :  { %1883 = vmatpush3.bf16.msra.mxu1 %v2057_v49 }
 0x21a   :  { %1884 = vmatprep.subr.bf16.mxu1 %v2271_v0 }
 0x21d   :  { %1885 = vmatpush3.bf16.msra.mxu1 %v2058_v50 }
 0x21e   :  { %1886 = vmatprep.subr.bf16.mxu1 %v2271_v0 }
 0x21f   :  { %v594_v19 = vpop.f32.mrf.mxu1 }
 0x220   :  { %v595_v23 = vadd.f32 %v1545_v20, %v594_v19  ;;  %v2066_v19 = vld [vmem:[#allocation8 + $0x98] sm:$0xff]  }
 0x221   :  { %v1814_v21 = vpop.f32.mrf.mxu1  ;;  %1887 = vmatpush3.bf16.msra.mxu1 %v2059_v51 }
 0x222   :  { %v808_v36 = vmax.f32 %v595_v23, 0.0  ;;  %1888 = vmatprep.subr.bf16.mxu1 %v2271_v0  ;;  %v2068_v21 = vld [vmem:[#allocation8 + $0x88] sm:$0xff]  }
 0x223   :  { %v597_v22 = vpop.f32.mrf.mxu1 }
 0x224   :  { %v598_v24 = vadd.f32 %v1545_v20, %v597_v22  ;;  %v2067_v20 = vld [vmem:[#allocation8 + $0x90] sm:$0xff]   ;;  %v2069_v22 = vld [vmem:[#allocation8 + $0x80] sm:$0xff]  }
 0x225   :  { %v1815_v25 = vpop.f32.mrf.mxu1  ;;  %1889 = vmatpush3.bf16.msra.mxu1 %v2060_v52 }
 0x226   :  { %v602_v27 = vpack.c.bf16 %v598_v24, %v595_v23  ;;  %v809_v35 = vmax.f32 %v598_v24, 0.0  ;;  %1890 = vmatprep.subr.bf16.mxu1 %v2271_v0 }
 0x228   :  { %1833 = vmatmul.mubr.bf16.vlgmr.msra.gmra.mxu0 %v602_v27  ;;  %v846_v37 = vpack.c.bf16 %v809_v35, %v808_v36  ;;  %v2071_v27 = vld [vmem:[#allocation11 + $0xb0] sm:$0xff]   ;;  %v2080_v36 = vld [vmem:[#allocation13 + $0xe8] sm:$0xff]  }
 0x229   :  { %1857 = vmatpush3.bf16.msra.mxu0 %v2038_v26  ;;  %1872 = vmatprep.mubr.msk.bf16.mxu0 %vm2272_vm0, %v2271_v0  ;;  %v2070_v26 = vld [vmem:[#allocation11 + $0xb8] sm:$0xff]   ;;  %v2079_v35 = vld [vmem:[#allocation13 + $0xf0] sm:$0xff]  }
 0x22a   :  { %1858 = vmatprep.subr.bf16.mxu0 %v2271_v0  ;;  %1891 = vmatpush3.bf16.msra.mxu1 %v2061_v53 }
 0x22b   :  { %1916 = vmatprep.subr.bf16.mxu1 %v2271_v0 }
 0x22d   :  { %1859 = vmatpush3.bf16.msra.mxu0 %v2039_v28  ;;  %v2072_v28 = vld [vmem:[#allocation11 + $0xa8] sm:$0xff]  }
 0x22e   :  { %1860 = vmatprep.subr.bf16.mxu0 %v2271_v0 }
 0x231   :  { %1861 = vmatpush3.bf16.msra.mxu0 %v2040_v29  ;;  %v2073_v29 = vld [vmem:[#allocation11 + $0xa0] sm:$0xff]  }
 0x232   :  { %1862 = vmatprep.subr.bf16.mxu0 %v2271_v0 }
 0x235   :  { %1863 = vmatpush3.bf16.msra.mxu0 %v2041_v30  ;;  %v2074_v30 = vld [vmem:[#allocation11 + $0x98] sm:$0xff]  }
 0x236   :  { %1864 = vmatprep.subr.bf16.mxu0 %v2271_v0 }
 0x239   :  { %1865 = vmatpush3.bf16.msra.mxu0 %v2042_v31  ;;  %v2075_v31 = vld [vmem:[#allocation11 + $0x90] sm:$0xff]  }
 0x23a   :  { %1866 = vmatprep.subr.bf16.mxu0 %v2271_v0 }
 0x23d   :  { %1867 = vmatpush3.bf16.msra.mxu0 %v2043_v32  ;;  %v2076_v32 = vld [vmem:[#allocation11 + $0x88] sm:$0xff]  }
 0x23e   :  { %1868 = vmatprep.subr.bf16.mxu0 %v2271_v0 }
 0x241   :  { %1869 = vmatpush3.bf16.msra.mxu0 %v2044_v33  ;;  %v2077_v33 = vld [vmem:[#allocation13 + $0xf8] sm:$0xff]  }
 0x242   :  { %1870 = vmatprep.subr.bf16.mxu0 %v2271_v0 }
 0x245   :  { %1871 = vmatpush3.bf16.msra.mxu0 %v2045_v34  ;;  %v2078_v34 = vld [vmem:[#allocation11 + $0x80] sm:$0xff]  }
 0x246   :  { %1896 = vmatprep.subr.bf16.mxu0 %v2271_v0 }
 0x248   :  { %1873 = vmatmul.mubr.bf16.vlgmr.msra.gmra.mxu0 %v846_v37  ;;  %v2081_v37 = vld [vmem:[#allocation13 + $0xe0] sm:$0xff]  }
 0x249   :  { %1912 = vmatprep.mubr.msk.bf16.mxu0 %vm2272_vm0, %v2271_v0  ;;  %1897 = vmatpush3.bf16.msra.mxu0 %v2046_v38  ;;  %v2082_v38 = vld [vmem:[#allocation13 + $0xd8] sm:$0xff]  }
 0x24a   :  { %1898 = vmatprep.subr.bf16.mxu0 %v2271_v0 }
 0x24d   :  { %1899 = vmatpush3.bf16.msra.mxu0 %v2047_v39  ;;  %v2083_v39 = vld [vmem:[#allocation13 + $0xd0] sm:$0xff]  }
 0x24e   :  { %1900 = vmatprep.subr.bf16.mxu0 %v2271_v0 }
 0x251   :  { %1901 = vmatpush3.bf16.msra.mxu0 %v2048_v40  ;;  %v2084_v40 = vld [vmem:[#allocation13 + $0xc8] sm:$0xff]  }
 0x252   :  { %1902 = vmatprep.subr.bf16.mxu0 %v2271_v0 }
 0x255   :  { %1903 = vmatpush3.bf16.msra.mxu0 %v2049_v41  ;;  %v2085_v41 = vld [vmem:[#allocation13 + $0xc0] sm:$0xff]  }
 0x256   :  { %1904 = vmatprep.subr.bf16.mxu0 %v2271_v0 }
 0x259   :  { %1905 = vmatpush3.bf16.msra.mxu0 %v2050_v42 }
 0x25a   :  { %1906 = vmatprep.subr.bf16.mxu0 %v2271_v0 }
 0x25d   :  { %1907 = vmatpush3.bf16.msra.mxu0 %v2051_v43 }
 0x25e   :  { %1908 = vmatprep.subr.bf16.mxu0 %v2271_v0 }
 0x261   :  { %1909 = vmatpush3.bf16.msra.mxu0 %v2052_v44 }
 0x262   :  { %1910 = vmatprep.subr.bf16.mxu0 %v2271_v0 }
 0x265   :  { %1911 = vmatpush3.bf16.msra.mxu0 %v2054_v46 }
 0x266   :  { %1936 = vmatprep.subr.bf16.mxu0 %v2271_v0 }
 0x2cc   :  { %v791_v54 = vpop.f32.mrf.mxu1 }
 0x2ce   :  { %v1854_v55 = vpop.f32.mrf.mxu1 }
 0x2d0   :  { %v794_v56 = vpop.f32.mrf.mxu1 }
 0x2d2   :  { %v1855_v57 = vpop.f32.mrf.mxu1 }
 0x2e8   :  { %v702_v58 = vpop.f32.mrf.mxu0 }
 0x2e9   :  { %v792_v59 = vadd.f32 %v791_v54, %v702_v58  ;;  %v1601_v58 = vld [vmem:[%s2520_s4 + $0x3] ss:$0 sm:$0xff]  ;;  %s2273_s4 = smov [#allocation14]  }
 0x2ea   :  { %v1834_v61 = vpop.f32.mrf.mxu0  ;;  %s1503_s16 = sshll.u32 %s2273_s4, 4  ;;  %s1504_s16 = int_to_ptr.vmem [resolvable:$true] %s1503_s16 }
 0x2eb   :  { %v806_v63 = vadd.f32 %v1571_v60, %v792_v59  ;;  %s2230_s17 = scalar_lea.vmem %s1504_s16, 256  ;;  %p2235_p8 = scmp.lt.s32.totalorder %s1504_s16, %s1504_s16 }
 0x2ec   :  { %v705_v62 = vpop.f32.mrf.mxu0  ;;  %p2231_p7 = scmp.ne.s32.totalorder %s1504_s16, %s2230_s17  ;;  %p2236_p9 = scmp.lt.s32.totalorder %s2230_s17, %s2230_s17 }
 0x2ed   :  { %v795_v1 = vadd.f32 %v794_v56, %v705_v62  ;;  %v810_v4 = vmax.f32 %v806_v63, 0.0 }
 0x2ee   :  { %v1835_v2 = vpop.f32.mrf.mxu0  ;;  %p2237_p10 = por %p2236_p9, %p2235_p8 }
 0x2ef   :  { %v807_v3 = vadd.f32 %v1571_v60, %v795_v1 }
 0x2f0   :  { %p2238_p11 = pnand %p2237_p10, %p2231_p7 }
 0x2f1   :  { %v811_v5 = vmax.f32 %v807_v3, 0.0 }
 0x2f3   :  { %v944_v6 = vpack.c.bf16 %v811_v5, %v810_v4 }
 0x2f5   :  { %1913 = vmatmul.mubr.bf16.vlgmr.msra.gmra.mxu0 %v944_v6 }
 0x2f6   :  { %1952 = vmatprep.mubr.msk.bf16.mxu0 %vm2272_vm0, %v2271_v0  ;;  %1937 = vmatpush3.bf16.msra.mxu0 %v2077_v33 }
 0x2f7   :  { %1938 = vmatprep.subr.bf16.mxu0 %v2271_v0 }
 0x2fa   :  { %1939 = vmatpush3.bf16.msra.mxu0 %v2079_v35 }
 0x2fb   :  { %1940 = vmatprep.subr.bf16.mxu0 %v2271_v0 }
 0x2fe   :  { %1941 = vmatpush3.bf16.msra.mxu0 %v2080_v36 }
 0x2ff   :  { %1942 = vmatprep.subr.bf16.mxu0 %v2271_v0 }
 0x302   :  { %1943 = vmatpush3.bf16.msra.mxu0 %v2081_v37 }
 0x303   :  { %1944 = vmatprep.subr.bf16.mxu0 %v2271_v0 }
 0x306   :  { %1945 = vmatpush3.bf16.msra.mxu0 %v2082_v38 }
 0x307   :  { %1946 = vmatprep.subr.bf16.mxu0 %v2271_v0 }
 0x308   :  { %v937_v7 = vpop.f32.mrf.mxu0 }
 0x309   :  { %v938_v11 = vadd.f32 %v1573_v8, %v937_v7  ;;  %v1627_v7 = vld [vmem:[%s2524_s8 + $0x3] ss:$0 sm:$0xff] }
 0x30a   :  { %v1874_v9 = vpop.f32.mrf.mxu0  ;;  %1947 = vmatpush3.bf16.msra.mxu0 %v2083_v39 }
 0x30b   :  { %v1151_v24 = vmax.f32 %v938_v11, 0.0  ;;  %1948 = vmatprep.subr.bf16.mxu0 %v2271_v0 }
 0x30c   :  { %v940_v10 = vpop.f32.mrf.mxu0 }
 0x30d   :  { %v941_v12 = vadd.f32 %v1573_v8, %v940_v10 }
 0x30e   :  { %v1875_v13 = vpop.f32.mrf.mxu0  ;;  %1949 = vmatpush3.bf16.msra.mxu0 %v2084_v40 }
 0x30f   :  { %v945_v15 = vpack.c.bf16 %v941_v12, %v938_v11  ;;  %v1152_v23 = vmax.f32 %v941_v12, 0.0  ;;  %1950 = vmatprep.subr.bf16.mxu0 %v2271_v0 }
 0x311   :  { %1893 = vmatmul.mubr.bf16.vlgmr.msra.gmra.mxu1 %v945_v15  ;;  %v1189_v25 = vpack.c.bf16 %v1152_v23, %v1151_v24 }
 0x312   :  { %1917 = vmatpush3.bf16.msra.mxu1 %v2062_v14  ;;  %1932 = vmatprep.mubr.msk.bf16.mxu1 %vm2272_vm0, %v2271_v0 }
 0x313   :  { %1918 = vmatprep.subr.bf16.mxu1 %v2271_v0  ;;  %1951 = vmatpush3.bf16.msra.mxu0 %v2085_v41 }
 0x316   :  { %1919 = vmatpush3.bf16.msra.mxu1 %v2063_v16 }
 0x317   :  { %1920 = vmatprep.subr.bf16.mxu1 %v2271_v0 }
 0x31a   :  { %1921 = vmatpush3.bf16.msra.mxu1 %v2064_v17 }
 0x31b   :  { %1922 = vmatprep.subr.bf16.mxu1 %v2271_v0 }
 0x31e   :  { %1923 = vmatpush3.bf16.msra.mxu1 %v2065_v18 }
 0x31f   :  { %1924 = vmatprep.subr.bf16.mxu1 %v2271_v0 }
 0x322   :  { %1925 = vmatpush3.bf16.msra.mxu1 %v2066_v19 }
 0x323   :  { %1926 = vmatprep.subr.bf16.mxu1 %v2271_v0 }
 0x326   :  { %1927 = vmatpush3.bf16.msra.mxu1 %v2067_v20 }
 0x327   :  { %1928 = vmatprep.subr.bf16.mxu1 %v2271_v0 }
 0x32a   :  { %1929 = vmatpush3.bf16.msra.mxu1 %v2068_v21 }
 0x32b   :  { %1930 = vmatprep.subr.bf16.mxu1 %v2271_v0 }
 0x32e   :  { %1931 = vmatpush3.bf16.msra.mxu1 %v2069_v22 }
 0x32f   :  { %1956 = vmatprep.subr.bf16.mxu1 %v2271_v0 }
 0x331   :  { %1933 = vmatmul.mubr.bf16.vlgmr.msra.gmra.mxu1 %v1189_v25 }
 0x332   :  { %1972 = vmatprep.mubr.msk.bf16.mxu1 %vm2272_vm0, %v2271_v0  ;;  %1957 = vmatpush3.bf16.msra.mxu1 %v2070_v26 }
 0x333   :  { %1958 = vmatprep.subr.bf16.mxu1 %v2271_v0 }
 0x336   :  { %1959 = vmatpush3.bf16.msra.mxu1 %v2071_v27 }
 0x337   :  { %1960 = vmatprep.subr.bf16.mxu1 %v2271_v0 }
 0x33a   :  { %1961 = vmatpush3.bf16.msra.mxu1 %v2072_v28 }
 0x33b   :  { %1962 = vmatprep.subr.bf16.mxu1 %v2271_v0 }
 0x33e   :  { %1963 = vmatpush3.bf16.msra.mxu1 %v2073_v29 }
 0x33f   :  { %1964 = vmatprep.subr.bf16.mxu1 %v2271_v0 }
 0x342   :  { %1965 = vmatpush3.bf16.msra.mxu1 %v2074_v30 }
 0x343   :  { %1966 = vmatprep.subr.bf16.mxu1 %v2271_v0 }
 0x346   :  { %1967 = vmatpush3.bf16.msra.mxu1 %v2075_v31 }
 0x347   :  { %1968 = vmatprep.subr.bf16.mxu1 %v2271_v0 }
 0x34a   :  { %1969 = vmatpush3.bf16.msra.mxu1 %v2076_v32 }
 0x34b   :  { %1970 = vmatprep.subr.bf16.mxu1 %v2271_v0 }
 0x34e   :  { %1971 = vmatpush3.bf16.msra.mxu1 %v2078_v34 }
 0x3b5   :  { %v1134_v42 = vpop.f32.mrf.mxu0 }
 0x3b7   :  { %v1914_v43 = vpop.f32.mrf.mxu0 }
 0x3b9   :  { %v1137_v44 = vpop.f32.mrf.mxu0 }
 0x3bb   :  { %v1915_v45 = vpop.f32.mrf.mxu0 }
 0x3d1   :  { %v1045_v46 = vpop.f32.mrf.mxu1 }
 0x3d2   :  { %v1135_v47 = vadd.f32 %v1134_v42, %v1045_v46 }
 0x3d3   :  { %v1894_v49 = vpop.f32.mrf.mxu1 }
 0x3d4   :  { %v1149_v51 = vadd.f32 %v1599_v48, %v1135_v47 }
 0x3d5   :  { %v1048_v50 = vpop.f32.mrf.mxu1 }
 0x3d6   :  { %v1138_v52 = vadd.f32 %v1137_v44, %v1048_v50  ;;  %v1153_v55 = vmax.f32 %v1149_v51, 0.0 }
 0x3d7   :  { %v1895_v53 = vpop.f32.mrf.mxu1 }
 0x3d8   :  { %v1150_v54 = vadd.f32 %v1599_v48, %v1138_v52 }
 0x3da   :  { %v1154_v0 = vmax.f32 %v1150_v54, 0.0 }
 0x3dc   :  { %v1287_v56 = vpack.c.bf16 %v1154_v0, %v1153_v55 }
 0x3de   :  { %1973 = vmatmul.mubr.bf16.vlgmr.msra.gmra.mxu1 %v1287_v56 }
 0x3f1   :  { %v1280_v57 = vpop.f32.mrf.mxu1 }
 0x3f2   :  { %v1281_v61 = vadd.f32 %v1601_v58, %v1280_v57 }
 0x3f3   :  { %v1934_v59 = vpop.f32.mrf.mxu1 }
 0x3f5   :  { %v1283_v60 = vpop.f32.mrf.mxu1 }
 0x3f6   :  { %v1284_v62 = vadd.f32 %v1601_v58, %v1283_v60 }
 0x3f7   :  { %v1935_v63 = vpop.f32.mrf.mxu1 }
 0x3f8   :  { %v1288_v1 = vpack.c.bf16 %v1284_v62, %v1281_v61 }
 0x3fa   :  { %1953 = vmatmul.mubr.bf16.vlgmr.msra.gmra.mxu0 %v1288_v1 }
 0x49e   :  { %v1477_v2 = vpop.f32.mrf.mxu1 }
 0x4a0   :  { %v1974_v3 = vpop.f32.mrf.mxu1 }
 0x4a2   :  { %v1480_v4 = vpop.f32.mrf.mxu1 }
 0x4a4   :  { %v1975_v5 = vpop.f32.mrf.mxu1 }
 0x4ba   :  { %v1388_v6 = vpop.f32.mrf.mxu0 }
 0x4bb   :  { %v1478_v8 = vadd.f32 %v1477_v2, %v1388_v6 }
 0x4bc   :  { %v1954_v9 = vpop.f32.mrf.mxu0 }
 0x4bd   :  { %v1492_v10 = vadd.f32 %v1627_v7, %v1478_v8 }
 0x4be   :  { %v1391_v11 = vpop.f32.mrf.mxu0 }
 0x4bf   :  { %2086 = vtanh.f32 %v1492_v10  ;;  %v1481_v12 = vadd.f32 %v1480_v4, %v1391_v11 }
 0x4c0   :  { %v1955_v13 = vpop.f32.mrf.mxu0 }
 0x4c1   :  { %v1493_v14 = vadd.f32 %v1627_v7, %v1481_v12 }
 0x4c3   :  { %2088 = vtanh.f32 %v1493_v14 }
 0x4cc   :  { %v2087_v15 = vpop.eup %2086 }
 0x4cd   :  { %1496 = vst [vmem:[#allocation14] sm:$0xff] %v2087_v15 }
 0x4d0   :  { %v2089_v16 = vpop.eup %2088 }
 0x4d1   :  { %1497 = vst [vmem:[#allocation14 + $0x8] sm:$0xff] %v2089_v16 }
 0x4d2   :  { %2241 = shalt.err (!%p2238_p11)
}
 0x4d3   :  { %1509 = dma.vmem_to_hbm [thread:$0]  %s1504_s16, 256, %s2525_s9, [#allocation4], %s2261_s12, %s2261_s12, %s2262_s13  }
 0x4d4   :  { %2258 = dma.done.wait [#allocation4], 256  }
 0x4d5   :  { %2259 = vsyncadd [#allocation4], 4294967040 }
 0x4d6   :  { %1513 = vsyncpa [#allocation3], 1 }
 0x4d7   :  { %1514 = vsyncpa [#allocation6], 1 }
 0x4d8   :  { %1515 = vsyncpa [#allocation9], 1 }
 0x4d9   :  { %1516 = vsyncpa [#allocation12], 1 }
 0x4da   :  { %1517 = vsyncpa [#allocation4], 1 }

</bundles_post_ra>
